<compile_context>
chip_gen: v7x
topology: tpu7x:2x2x1
jax: 0.10.0
libtpu: 0.0.40
codegen_flags: <defaults>
</compile_context>

<pallas_src>
import functools

import jax
import jax.numpy as jnp
from jax.experimental import pallas as pl
from jax.experimental.pallas import tpu as pltpu


def _round_up(v, m):
    return ((v + m - 1) // m) * m


def gru_kernel(x_ref, w_ih_ref, w_hh_rz_ref, w_hh_n_ref, b_gi_ref, b_hn_ref,
               w_fc_ref, b_fc_ref, out_ref, h_ref, gi_ref,
               *, seq_len, chunk, bpad, hsize, needs_mask):
    """One grid step = one chunk of `chunk` timesteps.

    x_ref     : (chunk*Bp, Ip)   time-major padded input for this chunk
    w_ih_ref  : (Ip, G)          input->gates, gates packed [r|z|n] in G lanes
    w_hh_rz_ref: (H, 2H)         hidden->(r,z) weights
    w_hh_n_ref : (H, H)          hidden->n weights
    b_gi_ref  : (1, G)           b_ir+b_hr | b_iz+b_hz | b_in  (folded)
    b_hn_ref  : (1, H)           hidden bias of the n gate (stays in the loop)
    w_fc_ref  : (H, Op)          final linear weight (transposed, padded)
    b_fc_ref  : (1, Op)          final linear bias
    out_ref   : (Bp, Op)         fc(h_T)
    h_ref     : (Bp, H)          carried hidden state (persists across grid)
    gi_ref    : (chunk*Bp, G)    per-chunk precomputed input-gate projection
    """
    H = hsize
    c = pl.program_id(0)
    last_c = pl.num_programs(0) - 1

    @pl.when(c == 0)
    def _init():
        h_ref[...] = jnp.zeros_like(h_ref)

    # (1) One batched input projection for the whole chunk; r/z hidden biases
    #     are already folded into b_gi, so this is the only place they appear.
    gi_ref[...] = (jnp.dot(x_ref[...], w_ih_ref[...],
                           preferred_element_type=jnp.float32)
                   + b_gi_ref[...])

    # Hoisted loop invariants (no per-timestep re-materialization).
    w_hh_rz = w_hh_rz_ref[...]                                   # (H, 2H)
    w_hh_n = w_hh_n_ref[...]                                     # (H, H)
    b_hn = jnp.broadcast_to(b_hn_ref[...], (bpad, H))            # (Bp, H)
    chunk_base = c * chunk

    def step(t, h):
        row = pl.multiple_of(t * bpad, bpad)
        gi_t = gi_ref[pl.ds(row, bpad), :]                       # (Bp, G)
        # Split recurrent dot: r/z half first, n half second (EUP overlap).
        gh_rz = jnp.dot(h, w_hh_rz, preferred_element_type=jnp.float32)
        gh_n = jnp.dot(h, w_hh_n, preferred_element_type=jnp.float32)
        # PyTorch nn.GRU gate order: reset | update | new.
        r = jax.nn.sigmoid(gi_t[:, 0:H] + gh_rz[:, 0:H])
        z = jax.nn.sigmoid(gi_t[:, H:2 * H] + gh_rz[:, H:2 * H])
        n = jnp.tanh(gi_t[:, 2 * H:3 * H] + r * (gh_n + b_hn))
        h_new = n + z * (h - n)                                  # == (1-z)*n + z*h
        if needs_mask:
            # Padded tail timesteps (when chunk does not divide T) are no-ops.
            h_new = jnp.where(chunk_base + t < seq_len, h_new, h)
        return h_new

    h = jax.lax.fori_loop(0, chunk, step, h_ref[...],
                          unroll=min(chunk, 8))
    h_ref[...] = h

    @pl.when(c == last_c)
    def _finalize():
        out_ref[...] = (jnp.dot(h, w_fc_ref[...],
                                preferred_element_type=jnp.float32)
                        + b_fc_ref[...]).astype(out_ref.dtype)


def gru_model_forward(x, w_ih, w_hh, b_ih, b_hh, w_fc, b_fc, *, time_chunk=None):
    """x: (B, T, I) float32 (batch_first, like PyTorch).  Returns (B, O)."""
    B, T, I = x.shape
    H = w_hh.shape[1]
    O = w_fc.shape[0]
    f32 = jnp.float32

    Bp = _round_up(B, 8)          # sublane multiple
    Ip = _round_up(I, 128)        # input lanes
    G = _round_up(3 * H, 128)     # packed gate lanes [r|z|n]
    Op = _round_up(O, 128)        # lane-dense output block

    if time_chunk is None:
        time_chunk = min(T, 32)
    TC = max(1, min(int(time_chunk), T))
    n_chunks = pl.cdiv(T, TC)
    Tpad = n_chunks * TC

    # Time-major, zero-padded input, flattened to (Tpad*Bp, Ip).
    x_tm = jnp.transpose(x, (1, 0, 2)).astype(f32)                      # (T,B,I)
    x_pad = jnp.zeros((Tpad, Bp, Ip), f32).at[:T, :B, :I].set(x_tm)
    x_flat = x_pad.reshape(Tpad * Bp, Ip)

    # Packed-gate input weights: columns [0:H)=r, [H:2H)=z, [2H:3H)=n.
    w_ih_p = jnp.zeros((Ip, G), f32).at[:I, :3 * H].set(
        jnp.transpose(w_ih).astype(f32))                                # (Ip, G)
    w_hh_t = jnp.transpose(w_hh).astype(f32)                            # (H, 3H)
    w_hh_rz = w_hh_t[:, :2 * H]                                         # (H, 2H)
    w_hh_n = w_hh_t[:, 2 * H:]                                          # (H, H)

    # Bias folding: r/z hidden biases move into the batched input projection;
    # only the n-gate hidden bias stays inside r * (gh_n + b_hn).
    b_ih32 = b_ih.astype(f32)
    b_hh32 = b_hh.astype(f32)
    b_gi = jnp.zeros((1, G), f32)
    b_gi = b_gi.at[0, :2 * H].set(b_ih32[:2 * H] + b_hh32[:2 * H])
    b_gi = b_gi.at[0, 2 * H:3 * H].set(b_ih32[2 * H:])
    b_hn = b_hh32[2 * H:].reshape(1, H)

    w_fc_p = jnp.zeros((H, Op), f32).at[:, :O].set(
        jnp.transpose(w_fc).astype(f32))                                # (H, Op)
    b_fc_p = jnp.zeros((1, Op), f32).at[0, :O].set(b_fc.astype(f32))    # (1, Op)

    kernel = functools.partial(
        gru_kernel, seq_len=T, chunk=TC, bpad=Bp, hsize=H,
        needs_mask=(Tpad != T))

    # Explicit VMEM budget sized from the actual buffers (+ headroom).
    est_bytes = 4 * (2 * TC * Bp * Ip          # x chunk (double-buffered)
                     + TC * Bp * G             # gi scratch
                     + Ip * G + 3 * H * H + H * Op   # weights
                     + G + H + Op              # biases
                     + 2 * Bp * Op + Bp * H)   # out + carried h
    vmem_limit = int(min(64 * 1024 * 1024, max(4 * 1024 * 1024, 2 * est_bytes)))

    grid_spec = pltpu.PrefetchScalarGridSpec(
        num_scalar_prefetch=0,
        grid=(n_chunks,),
        in_specs=[
            pl.BlockSpec((TC * Bp, Ip), lambda c: (c, 0)),   # x (per chunk)
            pl.BlockSpec((Ip, G), lambda c: (0, 0)),         # w_ih
            pl.BlockSpec((H, 2 * H), lambda c: (0, 0)),      # w_hh (r,z)
            pl.BlockSpec((H, H), lambda c: (0, 0)),          # w_hh (n)
            pl.BlockSpec((1, G), lambda c: (0, 0)),          # folded gi bias
            pl.BlockSpec((1, H), lambda c: (0, 0)),          # b_hn
            pl.BlockSpec((H, Op), lambda c: (0, 0)),         # w_fc
            pl.BlockSpec((1, Op), lambda c: (0, 0)),         # b_fc
        ],
        out_specs=pl.BlockSpec((Bp, Op), lambda c: (0, 0)),
        scratch_shapes=[
            pltpu.VMEM((Bp, H), f32),        # carried hidden state
            pltpu.VMEM((TC * Bp, G), f32),   # per-chunk input-gate projection
        ],
    )

    out_pad = pl.pallas_call(
        kernel,
        out_shape=jax.ShapeDtypeStruct((Bp, Op), f32),
        grid_spec=grid_spec,
        compiler_params=pltpu.CompilerParams(
            dimension_semantics=("arbitrary",),
            vmem_limit_bytes=vmem_limit),
    )(x_flat, w_ih_p, w_hh_rz, w_hh_n, b_gi, b_hn, w_fc_p, b_fc_p)

    return out_pad[:B, :O]


def gru_model_reference(x, w_ih, w_hh, b_ih, b_hh, w_fc, b_fc):
    """Pure-JAX reference matching torch.nn.GRU + Linear semantics."""
    B, T, I = x.shape
    H = w_hh.shape[1]

    def step(h, x_t):
        gi = x_t @ w_ih.T + b_ih
        gh = h @ w_hh.T + b_hh
        r = jax.nn.sigmoid(gi[:, :H] + gh[:, :H])
        z = jax.nn.sigmoid(gi[:, H:2 * H] + gh[:, H:2 * H])
        n = jnp.tanh(gi[:, 2 * H:] + r * gh[:, 2 * H:])
        h_new = (1.0 - z) * n + z * h
        return h_new, None

    h0 = jnp.zeros((B, H), jnp.float32)
    h_last, _ = jax.lax.scan(step, h0, jnp.transpose(x, (1, 0, 2)))
    return h_last @ w_fc.T + b_fc


if __name__ == "__main__":
    # Config stand-in: 4 features, hidden_size 32, 3 labels, seq_len 8, batch 2.
    B, T, I, H, O = 2, 8, 4, 32, 3

    key = jax.random.PRNGKey(0)
    ks = jax.random.split(key, 8)
    scale = 0.1
    x = jax.random.normal(ks[0], (B, T, I), jnp.float32)
    w_ih = jax.random.normal(ks[1], (3 * H, I), jnp.float32) * scale
    w_hh = jax.random.normal(ks[2], (3 * H, H), jnp.float32) * scale
    b_ih = jax.random.normal(ks[3], (3 * H,), jnp.float32) * scale
    b_hh = jax.random.normal(ks[4], (3 * H,), jnp.float32) * scale
    w_fc = jax.random.normal(ks[5], (O, H), jnp.float32) * scale
    b_fc = jax.random.normal(ks[6], (O,), jnp.float32) * scale

    ref = gru_model_reference(x, w_ih, w_hh, b_ih, b_hh, w_fc, b_fc)

    # Multi-chunk path (time grid of 2 chunks, h carried across grid steps).
    out_chunked = gru_model_forward(x, w_ih, w_hh, b_ih, b_hh, w_fc, b_fc,
                                    time_chunk=4)
    out_chunked = jax.block_until_ready(out_chunked)
    assert out_chunked.shape == (B, O)
    assert jnp.allclose(out_chunked, ref, atol=1e-4, rtol=1e-4)

    # Single-chunk path (whole sequence in one grid step).
    out_single = gru_model_forward(x, w_ih, w_hh, b_ih, b_hh, w_fc, b_fc)
    out_single = jax.block_until_ready(out_single)
    assert out_single.shape == (B, O)
    assert jnp.allclose(out_single, ref, atol=1e-4, rtol=1e-4)

    print("KERNEL_OK")
</pallas_src>

<mosaic_0001>
module attributes {stable_mosaic.version = 11 : i64} {
  func.func @gru_kernel(%arg0: i32, %arg1: memref<32x128xf32, #tpu.memory_space<vmem>>, %arg2: memref<128x128xf32, #tpu.memory_space<vmem>>, %arg3: memref<32x64xf32, #tpu.memory_space<vmem>>, %arg4: memref<32x32xf32, #tpu.memory_space<vmem>>, %arg5: memref<1x128xf32, #tpu.memory_space<vmem>>, %arg6: memref<1x32xf32, #tpu.memory_space<vmem>>, %arg7: memref<32x128xf32, #tpu.memory_space<vmem>>, %arg8: memref<1x128xf32, #tpu.memory_space<vmem>>, %arg9: memref<8x128xf32, #tpu.memory_space<vmem>>, %arg10: memref<8x32xf32, #tpu.memory_space<vmem>>, %arg11: memref<32x128xf32, #tpu.memory_space<vmem>>) attributes {dimension_semantics = [#tpu.dimension_semantics<arbitrary>], iteration_bounds = array<i64: 2>, scalar_prefetch = 0 : i64, scratch_operands = 2 : i64, tpu.core_type = #tpu.core_type<tc>, window_params = [{transform_indices = @transform_0, window_bounds = array<i64: 32, 128>}, {pipeline_mode = #tpu.pipeline_mode<synchronous>, transform_indices = @transform_1, window_bounds = array<i64: 128, 128>}, {pipeline_mode = #tpu.pipeline_mode<synchronous>, transform_indices = @transform_2, window_bounds = array<i64: 32, 64>}, {pipeline_mode = #tpu.pipeline_mode<synchronous>, transform_indices = @transform_3, window_bounds = array<i64: 32, 32>}, {pipeline_mode = #tpu.pipeline_mode<synchronous>, transform_indices = @transform_4, window_bounds = array<i64: 1, 128>}, {pipeline_mode = #tpu.pipeline_mode<synchronous>, transform_indices = @transform_5, window_bounds = array<i64: 1, 32>}, {pipeline_mode = #tpu.pipeline_mode<synchronous>, transform_indices = @transform_6, window_bounds = array<i64: 32, 128>}, {pipeline_mode = #tpu.pipeline_mode<synchronous>, transform_indices = @transform_7, window_bounds = array<i64: 1, 128>}, {pipeline_mode = #tpu.pipeline_mode<synchronous>, transform_indices = @transform_8, window_bounds = array<i64: 8, 128>}]} {
    %c0_i32 = arith.constant 0 : i32
    %0 = arith.cmpi eq, %arg0, %c0_i32 : i32
    %1 = arith.extui %0 : i1 to i32
    %c0_i32_0 = arith.constant 0 : i32
    %2 = arith.cmpi ne, %1, %c0_i32_0 : i32
    scf.if %2 {
      %cst_44 = arith.constant 0.000000e+00 : f32
      %140 = vector.broadcast %cst_44 : f32 to vector<8x32xf32>
      %c0_45 = arith.constant 0 : index
      %c0_46 = arith.constant 0 : index
      %141 = vector.load %arg10[%c0_45, %c0_46] : memref<8x32xf32, #tpu.memory_space<vmem>>, vector<8x32xf32>
      tpu.vector_store %arg10[%c0_45, %c0_46], %140 {strides = array<i32>} : memref<8x32xf32, #tpu.memory_space<vmem>>, vector<8x32xf32>,
    } else {
    }
    %c0 = arith.constant 0 : index
    %c0_1 = arith.constant 0 : index
    %3 = vector.load %arg1[%c0, %c0_1] : memref<32x128xf32, #tpu.memory_space<vmem>>, vector<32x128xf32>
    %c0_2 = arith.constant 0 : index
    %c0_3 = arith.constant 0 : index
    %4 = vector.load %arg2[%c0_2, %c0_3] : memref<128x128xf32, #tpu.memory_space<vmem>>, vector<128x128xf32>
    %cst = arith.constant dense<0.000000e+00> : vector<32x128xf32>
    %5 = tpu.matmul %3, %4, %cst {dimension_numbers = #tpu.dot_dimension_numbers<[1], [0], [0], [1], [0, 0, 1, 1], [], []>} : vector<32x128xf32>, vector<128x128xf32>, vector<32x128xf32> -> vector<32x128xf32>
    %c0_4 = arith.constant 0 : index
    %c0_5 = arith.constant 0 : index
    %6 = vector.load %arg5[%c0_4, %c0_5] : memref<1x128xf32, #tpu.memory_space<vmem>>, vector<1x128xf32>
    %7 = vector.broadcast %6 : vector<1x128xf32> to vector<32x128xf32>
    %8 = arith.addf %5, %7 : vector<32x128xf32>
    %c0_6 = arith.constant 0 : index
    %c0_7 = arith.constant 0 : index
    %9 = vector.load %arg11[%c0_6, %c0_7] : memref<32x128xf32, #tpu.memory_space<vmem>>, vector<32x128xf32>
    tpu.vector_store %arg11[%c0_6, %c0_7], %8 {strides = array<i32>} : memref<32x128xf32, #tpu.memory_space<vmem>>, vector<32x128xf32>,
    %c0_8 = arith.constant 0 : index
    %c0_9 = arith.constant 0 : index
    %10 = vector.load %arg3[%c0_8, %c0_9] : memref<32x64xf32, #tpu.memory_space<vmem>>, vector<32x64xf32>
    %c0_10 = arith.constant 0 : index
    %c0_11 = arith.constant 0 : index
    %11 = vector.load %arg4[%c0_10, %c0_11] : memref<32x32xf32, #tpu.memory_space<vmem>>, vector<32x32xf32>
    %c0_12 = arith.constant 0 : index
    %c0_13 = arith.constant 0 : index
    %12 = vector.load %arg6[%c0_12, %c0_13] : memref<1x32xf32, #tpu.memory_space<vmem>>, vector<1x32xf32>
    %13 = vector.shape_cast %12 : vector<1x32xf32> to vector<1x32xf32>
    %14 = vector.broadcast %13 : vector<1x32xf32> to vector<8x32xf32>
    %c0_14 = arith.constant 0 : index
    %c0_15 = arith.constant 0 : index
    %15 = vector.load %arg10[%c0_14, %c0_15] : memref<8x32xf32, #tpu.memory_space<vmem>>, vector<8x32xf32>
    %c0_i32_16 = arith.constant 0 : i32
    %c8_i32 = arith.constant 8 : i32
    %16 = arith.muli %c0_i32_16, %c8_i32 : i32
    %17 = tpu.assume_multiple %16, 8 : i32
    %18 = arith.index_cast %17 : i32 to index
    %c0_17 = arith.constant 0 : index
    %19 = vector.load %arg11[%18, %c0_17] : memref<32x128xf32, #tpu.memory_space<vmem>>, vector<8x128xf32>
    %cst_18 = arith.constant dense<0.000000e+00> : vector<8x64xf32>
    %20 = tpu.matmul %15, %10, %cst_18 {dimension_numbers = #tpu.dot_dimension_numbers<[1], [0], [0], [1], [0, 0, 1, 1], [], []>} : vector<8x32xf32>, vector<32x64xf32>, vector<8x64xf32> -> vector<8x64xf32>
    %cst_19 = arith.constant dense<0.000000e+00> : vector<8x32xf32>
    %21 = tpu.matmul %15, %11, %cst_19 {dimension_numbers = #tpu.dot_dimension_numbers<[1], [0], [0], [1], [0, 0, 1, 1], [], []>} : vector<8x32xf32>, vector<32x32xf32>, vector<8x32xf32> -> vector<8x32xf32>
    %22 = vector.extract_strided_slice %19 {offsets = [0, 0], sizes = [8, 32], strides = [1, 1]} : vector<8x128xf32> to vector<8x32xf32>
    %23 = vector.extract_strided_slice %20 {offsets = [0, 0], sizes = [8, 32], strides = [1, 1]} : vector<8x64xf32> to vector<8x32xf32>
    %24 = arith.addf %22, %23 : vector<8x32xf32>
    %25 = arith.negf %24 : vector<8x32xf32>
    %26 = math.exp %25 : vector<8x32xf32>
    %cst_20 = arith.constant 1.000000e+00 : f32
    %27 = vector.broadcast %cst_20 : f32 to vector<8x32xf32>
    %28 = arith.addf %27, %26 : vector<8x32xf32>
    %29 = arith.divf %27, %28 : vector<8x32xf32>
    %30 = vector.extract_strided_slice %19 {offsets = [0, 32], sizes = [8, 32], strides = [1, 1]} : vector<8x128xf32> to vector<8x32xf32>
    %31 = vector.extract_strided_slice %20 {offsets = [0, 32], sizes = [8, 32], strides = [1, 1]} : vector<8x64xf32> to vector<8x32xf32>
    %32 = arith.addf %30, %31 : vector<8x32xf32>
    %33 = arith.negf %32 : vector<8x32xf32>
    %34 = math.exp %33 : vector<8x32xf32>
    %cst_21 = arith.constant 1.000000e+00 : f32
    %35 = vector.broadcast %cst_21 : f32 to vector<8x32xf32>
    %36 = arith.addf %35, %34 : vector<8x32xf32>
    %37 = arith.divf %35, %36 : vector<8x32xf32>
    %38 = vector.extract_strided_slice %19 {offsets = [0, 64], sizes = [8, 32], strides = [1, 1]} : vector<8x128xf32> to vector<8x32xf32>
    %39 = arith.addf %21, %14 : vector<8x32xf32>
    %40 = arith.mulf %29, %39 : vector<8x32xf32>
    %41 = arith.addf %38, %40 : vector<8x32xf32>
    %42 = math.tanh %41 : vector<8x32xf32>
    %43 = arith.subf %15, %42 : vector<8x32xf32>
    %44 = arith.mulf %37, %43 : vector<8x32xf32>
    %45 = arith.addf %42, %44 : vector<8x32xf32>
    %c1_i32 = arith.constant 1 : i32
    %c8_i32_22 = arith.constant 8 : i32
    %46 = arith.muli %c1_i32, %c8_i32_22 : i32
    %47 = tpu.assume_multiple %46, 8 : i32
    %48 = arith.index_cast %47 : i32 to index
    %c0_23 = arith.constant 0 : index
    %49 = vector.load %arg11[%48, %c0_23] : memref<32x128xf32, #tpu.memory_space<vmem>>, vector<8x128xf32>
    %cst_24 = arith.constant dense<0.000000e+00> : vector<8x64xf32>
    %50 = tpu.matmul %45, %10, %cst_24 {dimension_numbers = #tpu.dot_dimension_numbers<[1], [0], [0], [1], [0, 0, 1, 1], [], []>} : vector<8x32xf32>, vector<32x64xf32>, vector<8x64xf32> -> vector<8x64xf32>
    %cst_25 = arith.constant dense<0.000000e+00> : vector<8x32xf32>
    %51 = tpu.matmul %45, %11, %cst_25 {dimension_numbers = #tpu.dot_dimension_numbers<[1], [0], [0], [1], [0, 0, 1, 1], [], []>} : vector<8x32xf32>, vector<32x32xf32>, vector<8x32xf32> -> vector<8x32xf32>
    %52 = vector.extract_strided_slice %49 {offsets = [0, 0], sizes = [8, 32], strides = [1, 1]} : vector<8x128xf32> to vector<8x32xf32>
    %53 = vector.extract_strided_slice %50 {offsets = [0, 0], sizes = [8, 32], strides = [1, 1]} : vector<8x64xf32> to vector<8x32xf32>
    %54 = arith.addf %52, %53 : vector<8x32xf32>
    %55 = arith.negf %54 : vector<8x32xf32>
    %56 = math.exp %55 : vector<8x32xf32>
    %cst_26 = arith.constant 1.000000e+00 : f32
    %57 = vector.broadcast %cst_26 : f32 to vector<8x32xf32>
    %58 = arith.addf %57, %56 : vector<8x32xf32>
    %59 = arith.divf %57, %58 : vector<8x32xf32>
    %60 = vector.extract_strided_slice %49 {offsets = [0, 32], sizes = [8, 32], strides = [1, 1]} : vector<8x128xf32> to vector<8x32xf32>
    %61 = vector.extract_strided_slice %50 {offsets = [0, 32], sizes = [8, 32], strides = [1, 1]} : vector<8x64xf32> to vector<8x32xf32>
    %62 = arith.addf %60, %61 : vector<8x32xf32>
    %63 = arith.negf %62 : vector<8x32xf32>
    %64 = math.exp %63 : vector<8x32xf32>
    %cst_27 = arith.constant 1.000000e+00 : f32
    %65 = vector.broadcast %cst_27 : f32 to vector<8x32xf32>
    %66 = arith.addf %65, %64 : vector<8x32xf32>
    %67 = arith.divf %65, %66 : vector<8x32xf32>
    %68 = vector.extract_strided_slice %49 {offsets = [0, 64], sizes = [8, 32], strides = [1, 1]} : vector<8x128xf32> to vector<8x32xf32>
    %69 = arith.addf %51, %14 : vector<8x32xf32>
    %70 = arith.mulf %59, %69 : vector<8x32xf32>
    %71 = arith.addf %68, %70 : vector<8x32xf32>
    %72 = math.tanh %71 : vector<8x32xf32>
    %73 = arith.subf %45, %72 : vector<8x32xf32>
    %74 = arith.mulf %67, %73 : vector<8x32xf32>
    %75 = arith.addf %72, %74 : vector<8x32xf32>
    %c2_i32 = arith.constant 2 : i32
    %c8_i32_28 = arith.constant 8 : i32
    %76 = arith.muli %c2_i32, %c8_i32_28 : i32
    %77 = tpu.assume_multiple %76, 8 : i32
    %78 = arith.index_cast %77 : i32 to index
    %c0_29 = arith.constant 0 : index
    %79 = vector.load %arg11[%78, %c0_29] : memref<32x128xf32, #tpu.memory_space<vmem>>, vector<8x128xf32>
    %cst_30 = arith.constant dense<0.000000e+00> : vector<8x64xf32>
    %80 = tpu.matmul %75, %10, %cst_30 {dimension_numbers = #tpu.dot_dimension_numbers<[1], [0], [0], [1], [0, 0, 1, 1], [], []>} : vector<8x32xf32>, vector<32x64xf32>, vector<8x64xf32> -> vector<8x64xf32>
    %cst_31 = arith.constant dense<0.000000e+00> : vector<8x32xf32>
    %81 = tpu.matmul %75, %11, %cst_31 {dimension_numbers = #tpu.dot_dimension_numbers<[1], [0], [0], [1], [0, 0, 1, 1], [], []>} : vector<8x32xf32>, vector<32x32xf32>, vector<8x32xf32> -> vector<8x32xf32>
    %82 = vector.extract_strided_slice %79 {offsets = [0, 0], sizes = [8, 32], strides = [1, 1]} : vector<8x128xf32> to vector<8x32xf32>
    %83 = vector.extract_strided_slice %80 {offsets = [0, 0], sizes = [8, 32], strides = [1, 1]} : vector<8x64xf32> to vector<8x32xf32>
    %84 = arith.addf %82, %83 : vector<8x32xf32>
    %85 = arith.negf %84 : vector<8x32xf32>
    %86 = math.exp %85 : vector<8x32xf32>
    %cst_32 = arith.constant 1.000000e+00 : f32
    %87 = vector.broadcast %cst_32 : f32 to vector<8x32xf32>
    %88 = arith.addf %87, %86 : vector<8x32xf32>
    %89 = arith.divf %87, %88 : vector<8x32xf32>
    %90 = vector.extract_strided_slice %79 {offsets = [0, 32], sizes = [8, 32], strides = [1, 1]} : vector<8x128xf32> to vector<8x32xf32>
    %91 = vector.extract_strided_slice %80 {offsets = [0, 32], sizes = [8, 32], strides = [1, 1]} : vector<8x64xf32> to vector<8x32xf32>
    %92 = arith.addf %90, %91 : vector<8x32xf32>
    %93 = arith.negf %92 : vector<8x32xf32>
    %94 = math.exp %93 : vector<8x32xf32>
    %cst_33 = arith.constant 1.000000e+00 : f32
    %95 = vector.broadcast %cst_33 : f32 to vector<8x32xf32>
    %96 = arith.addf %95, %94 : vector<8x32xf32>
    %97 = arith.divf %95, %96 : vector<8x32xf32>
    %98 = vector.extract_strided_slice %79 {offsets = [0, 64], sizes = [8, 32], strides = [1, 1]} : vector<8x128xf32> to vector<8x32xf32>
    %99 = arith.addf %81, %14 : vector<8x32xf32>
    %100 = arith.mulf %89, %99 : vector<8x32xf32>
    %101 = arith.addf %98, %100 : vector<8x32xf32>
    %102 = math.tanh %101 : vector<8x32xf32>
    %103 = arith.subf %75, %102 : vector<8x32xf32>
    %104 = arith.mulf %97, %103 : vector<8x32xf32>
    %105 = arith.addf %102, %104 : vector<8x32xf32>
    %c3_i32 = arith.constant 3 : i32
    %c8_i32_34 = arith.constant 8 : i32
    %106 = arith.muli %c3_i32, %c8_i32_34 : i32
    %107 = tpu.assume_multiple %106, 8 : i32
    %108 = arith.index_cast %107 : i32 to index
    %c0_35 = arith.constant 0 : index
    %109 = vector.load %arg11[%108, %c0_35] : memref<32x128xf32, #tpu.memory_space<vmem>>, vector<8x128xf32>
    %cst_36 = arith.constant dense<0.000000e+00> : vector<8x64xf32>
    %110 = tpu.matmul %105, %10, %cst_36 {dimension_numbers = #tpu.dot_dimension_numbers<[1], [0], [0], [1], [0, 0, 1, 1], [], []>} : vector<8x32xf32>, vector<32x64xf32>, vector<8x64xf32> -> vector<8x64xf32>
    %cst_37 = arith.constant dense<0.000000e+00> : vector<8x32xf32>
    %111 = tpu.matmul %105, %11, %cst_37 {dimension_numbers = #tpu.dot_dimension_numbers<[1], [0], [0], [1], [0, 0, 1, 1], [], []>} : vector<8x32xf32>, vector<32x32xf32>, vector<8x32xf32> -> vector<8x32xf32>
    %112 = vector.extract_strided_slice %109 {offsets = [0, 0], sizes = [8, 32], strides = [1, 1]} : vector<8x128xf32> to vector<8x32xf32>
    %113 = vector.extract_strided_slice %110 {offsets = [0, 0], sizes = [8, 32], strides = [1, 1]} : vector<8x64xf32> to vector<8x32xf32>
    %114 = arith.addf %112, %113 : vector<8x32xf32>
    %115 = arith.negf %114 : vector<8x32xf32>
    %116 = math.exp %115 : vector<8x32xf32>
    %cst_38 = arith.constant 1.000000e+00 : f32
    %117 = vector.broadcast %cst_38 : f32 to vector<8x32xf32>
    %118 = arith.addf %117, %116 : vector<8x32xf32>
    %119 = arith.divf %117, %118 : vector<8x32xf32>
    %120 = vector.extract_strided_slice %109 {offsets = [0, 32], sizes = [8, 32], strides = [1, 1]} : vector<8x128xf32> to vector<8x32xf32>
    %121 = vector.extract_strided_slice %110 {offsets = [0, 32], sizes = [8, 32], strides = [1, 1]} : vector<8x64xf32> to vector<8x32xf32>
    %122 = arith.addf %120, %121 : vector<8x32xf32>
    %123 = arith.negf %122 : vector<8x32xf32>
    %124 = math.exp %123 : vector<8x32xf32>
    %cst_39 = arith.constant 1.000000e+00 : f32
    %125 = vector.broadcast %cst_39 : f32 to vector<8x32xf32>
    %126 = arith.addf %125, %124 : vector<8x32xf32>
    %127 = arith.divf %125, %126 : vector<8x32xf32>
    %128 = vector.extract_strided_slice %109 {offsets = [0, 64], sizes = [8, 32], strides = [1, 1]} : vector<8x128xf32> to vector<8x32xf32>
    %129 = arith.addf %111, %14 : vector<8x32xf32>
    %130 = arith.mulf %119, %129 : vector<8x32xf32>
    %131 = arith.addf %128, %130 : vector<8x32xf32>
    %132 = math.tanh %131 : vector<8x32xf32>
    %133 = arith.subf %105, %132 : vector<8x32xf32>
    %134 = arith.mulf %127, %133 : vector<8x32xf32>
    %135 = arith.addf %132, %134 : vector<8x32xf32>
    %c4_i32 = arith.constant 4 : i32
    %c0_40 = arith.constant 0 : index
    %c0_41 = arith.constant 0 : index
    %136 = vector.load %arg10[%c0_40, %c0_41] : memref<8x32xf32, #tpu.memory_space<vmem>>, vector<8x32xf32>
    tpu.vector_store %arg10[%c0_40, %c0_41], %135 {strides = array<i32>} : memref<8x32xf32, #tpu.memory_space<vmem>>, vector<8x32xf32>,
    %c1_i32_42 = arith.constant 1 : i32
    %137 = arith.cmpi eq, %arg0, %c1_i32_42 : i32
    %138 = arith.extui %137 : i1 to i32
    %c0_i32_43 = arith.constant 0 : i32
    %139 = arith.cmpi ne, %138, %c0_i32_43 : i32
    scf.if %139 {
      %c0_44 = arith.constant 0 : index
      %c0_45 = arith.constant 0 : index
      %140 = vector.load %arg7[%c0_44, %c0_45] : memref<32x128xf32, #tpu.memory_space<vmem>>, vector<32x128xf32>
      %cst_46 = arith.constant dense<0.000000e+00> : vector<8x128xf32>
      %141 = tpu.matmul %135, %140, %cst_46 {dimension_numbers = #tpu.dot_dimension_numbers<[1], [0], [0], [1], [0, 0, 1, 1], [], []>} : vector<8x32xf32>, vector<32x128xf32>, vector<8x128xf32> -> vector<8x128xf32>
      %c0_47 = arith.constant 0 : index
      %c0_48 = arith.constant 0 : index
      %142 = vector.load %arg8[%c0_47, %c0_48] : memref<1x128xf32, #tpu.memory_space<vmem>>, vector<1x128xf32>
      %143 = vector.broadcast %142 : vector<1x128xf32> to vector<8x128xf32>
      %144 = arith.addf %141, %143 : vector<8x128xf32>
      %c0_49 = arith.constant 0 : index
      %c0_50 = arith.constant 0 : index
      %145 = vector.load %arg9[%c0_49, %c0_50] : memref<8x128xf32, #tpu.memory_space<vmem>>, vector<8x128xf32>
      tpu.vector_store %arg9[%c0_49, %c0_50], %144 {strides = array<i32>} : memref<8x128xf32, #tpu.memory_space<vmem>>, vector<8x128xf32>,
    } else {
    }
    return
  }
  func.func @transform_0(%arg0: i32) -> (i32, i32) {
    %c0_i32 = arith.constant 0 : i32
    %c0_i32_0 = arith.constant 0 : i32
    return %arg0, %c0_i32 : i32, i32
  }
  func.func @transform_1(%arg0: i32) -> (i32, i32) {
    %c0_i32 = arith.constant 0 : i32
    %c0_i32_0 = arith.constant 0 : i32
    %c0_i32_1 = arith.constant 0 : i32
    return %c0_i32, %c0_i32_0 : i32, i32
  }
  func.func @transform_2(%arg0: i32) -> (i32, i32) {
    %c0_i32 = arith.constant 0 : i32
    %c0_i32_0 = arith.constant 0 : i32
    %c0_i32_1 = arith.constant 0 : i32
    return %c0_i32, %c0_i32_0 : i32, i32
  }
  func.func @transform_3(%arg0: i32) -> (i32, i32) {
    %c0_i32 = arith.constant 0 : i32
    %c0_i32_0 = arith.constant 0 : i32
    %c0_i32_1 = arith.constant 0 : i32
    return %c0_i32, %c0_i32_0 : i32, i32
  }
  func.func @transform_4(%arg0: i32) -> (i32, i32) {
    %c0_i32 = arith.constant 0 : i32
    %c0_i32_0 = arith.constant 0 : i32
    %c0_i32_1 = arith.constant 0 : i32
    return %c0_i32, %c0_i32_0 : i32, i32
  }
  func.func @transform_5(%arg0: i32) -> (i32, i32) {
    %c0_i32 = arith.constant 0 : i32
    %c0_i32_0 = arith.constant 0 : i32
    %c0_i32_1 = arith.constant 0 : i32
    return %c0_i32, %c0_i32_0 : i32, i32
  }
  func.func @transform_6(%arg0: i32) -> (i32, i32) {
    %c0_i32 = arith.constant 0 : i32
    %c0_i32_0 = arith.constant 0 : i32
    %c0_i32_1 = arith.constant 0 : i32
    return %c0_i32, %c0_i32_0 : i32, i32
  }
  func.func @transform_7(%arg0: i32) -> (i32, i32) {
    %c0_i32 = arith.constant 0 : i32
    %c0_i32_0 = arith.constant 0 : i32
    %c0_i32_1 = arith.constant 0 : i32
    return %c0_i32, %c0_i32_0 : i32, i32
  }
  func.func @transform_8(%arg0: i32) -> (i32, i32) {
    %c0_i32 = arith.constant 0 : i32
    %c0_i32_0 = arith.constant 0 : i32
    %c0_i32_1 = arith.constant 0 : i32
    return %c0_i32, %c0_i32_0 : i32, i32
  }
}

</mosaic_0001>

<bundles_post_ra>
// kernel: tpu_custom_call.1
= control target key start
LH: loop header
LB: loop body
LE: loop exit
PB: predicated region body
PF: predicated region fallthrough
CT: control target
= control target key end

     0   :  { %13 = vsyncpa [#allocation5], 0  ;;  %s2493_s0 = inlined_call_operand.hbm [shape: f32[64,128], index: 0, kind: input, shape index: {}]   ;;  %s2494_s1 = inlined_call_operand.hbm [shape: f32[128,128], index: 1, kind: input, shape index: {}]   ;;  %s2495_s2 = inlined_call_operand.hbm [shape: f32[32,64], index: 2, kind: input, shape index: {}]   ;;  %s2496_s3 = inlined_call_operand.hbm [shape: f32[32,32], index: 3, kind: input, shape index: {}]   ;;  %s2497_s4 = inlined_call_operand.vmem [shape: f32[1,128], index: 4, kind: input, shape index: {}]   ;;  %s2498_s5 = inlined_call_operand.vmem [shape: f32[1,32], index: 5, kind: input, shape index: {}]   ;;  %s2499_s6 = inlined_call_operand.hbm [shape: f32[32,128], index: 6, kind: input, shape index: {}]   ;;  %s2500_s7 = inlined_call_operand.vmem [shape: f32[1,128], index: 7, kind: input, shape index: {}]   ;;  %s2501_s8 = inlined_call_operand.hbm [shape: f32[8,128], index: 8, kind: output, shape index: {}]  }
   0x1   :  { %15 = vsyncpa [#allocation5 + $0x1], 0 }
   0x2   :  { %16 = vsyncpa [#allocation8], 0 }
   0x3   :  { %17 = vsyncpa [#allocation11], 0 }
   0x4   :  { %18 = vsyncpa [#allocation6], 0  ;;  %s2116_s27 = smov 0   ;;  %s2118_s28 = smov 0  }
   0x5   :  { %s2120_s29 = smov 0   ;;  %s2122_s30 = smov 0  }
   0x6 LB: > { %s2135_s9 = sadd.s32 4294967295, %s2051_s30   ;;  %p44_p0 = scmp.ne.s32.totalorder %s2043_s28, %s2039_s27  ;;  %s2051_s30 = sphi %s2122_s30, %s2520_s30   ;;  %s2047_s29 = sphi %s2120_s29, %s2519_s29   ;;  %s2043_s28 = sphi %s2118_s28, %s2518_s28   ;;  %s2039_s27 = sphi %s2116_s27, %s2517_s27  }
   0x7   : > { %p2502_p1 = scmp.eq.s32.totalorder %s2135_s9, 0  ;;  %p1388_p2 = scmp.ge.s32.totalorder %s2051_s30, 1 }
   0x8   : > { %p223_p3 = scmp.lt.s32.totalorder %s2051_s30, 3  ;;  %s2053_s12 = smov [#allocation7]  }
   0x9   : > { %p2144_p5 = por %p2502_p1, %p44_p0  ;;  %s235_s13 = sshll.u32 %s2053_s12, 4  ;;  %s2152_s13 = int_to_ptr.vmem [resolvable:$true] %s235_s13 }
   0xa   : > { %p2148_p6 = pnand %p1388_p2, %p223_p3  ;;  %s2054_s15 = smov [#allocation10]  }
   0xb   : > { %s2505_s10 = scalar_select %p2144_p5, 1, 0 }
   0xc   : > { %s2506_s11 = scalar_select %p2148_p6, 1, 0 }
   0xd   : > { %p1736_p7 = pneg %p2148_p6  ;;  %s261_s16 = sshll.u32 %s2054_s15, 4  ;;  %s2162_s16 = int_to_ptr.vmem [resolvable:$true] %s261_s16 }
   0xe   : > { %s2055_s17 = smov [#allocation9]   ;;  %s1837_s21 = scalar_lea.hbm %s2494_s1, 2048 }
   0xf   : > { %p2158_p8 = pnand %p1736_p7, %p2502_p1  ;;  %s2164_s18 = sshll.u32 %s2055_s17, 4  ;;  %s249_s18 = int_to_ptr.vmem [resolvable:$true] %s2164_s18 }
  0x10   : > { %p1838_p9 = scmp.ne.s32.totalorder %s2494_s1, %s1837_s21  ;;  %p1844_p13 = scmp.lt.u32.totalorder %s1837_s21, %s2494_s1 }
  0x11   : > { %p2174_p10 = pneg %p2158_p8 }
  0x13   : > { %p1840_p11 = pnand %p2174_p10, %p1838_p9 }
  0x15   : > { %p1841_p12 = pneg %p1840_p11 }
  0x17   : > { %p1846_p0 = pnand %p1844_p13, %p1841_p12 }
  0x19   : > { %1849 = shalt.err (!%p1846_p0)
}
  0x1a   : > { %s1850_s27 = scalar_lea.vmem %s2152_s13, 2048  ;;  %p1858_p4 = scmp.lt.s32.totalorder %s2152_s13, %s2152_s13 }
  0x1b   : > { %p1851_p2 = scmp.ne.s32.totalorder %s2152_s13, %s1850_s27  ;;  %p1859_p1 = scmp.lt.s32.totalorder %s1850_s27, %s1850_s27 }
  0x1d   : > { %p1853_p3 = pnand %p1851_p2, %p2174_p10  ;;  %p1860_p9 = por %p1859_p1, %p1858_p4 }
  0x1f   : > { %p1854_p7 = pneg %p1853_p3 }
  0x21   : > { %p1861_p11 = pnand %p1860_p9, %p1854_p7 }
  0x23   : > { %1864 = shalt.err (!%p1861_p11)
}
  0x24   : > { %s2056_s12 = smov 128   ;;  %s2057_s15 = smov 8  }
  0x25   : > { %1739 = dma.hbm_to_vmem [thread:$0]  (!%p2158_p8), %s2494_s1, 2048, %s2152_s13, [#allocation8], %s2056_s12, %s2056_s12, %s2057_s15  }
  0x26   : > { %s1865_s22 = scalar_lea.hbm %s2496_s3, 512 }
  0x27   : > { %p1866_p1 = scmp.ne.s32.totalorder %s2496_s3, %s1865_s22  ;;  %p1872_p13 = scmp.lt.u32.totalorder %s1865_s22, %s2496_s3 }
  0x29   : > { %p1868_p4 = pnand %p1866_p1, %p2174_p10 }
  0x2b   : > { %p1869_p12 = pneg %p1868_p4 }
  0x2d   : > { %p1874_p0 = pnand %p1872_p13, %p1869_p12 }
  0x2f   : > { %1877 = shalt.err (!%p1874_p0)
}
  0x30   : > { %s1878_s13 = scalar_lea.vmem %s2162_s16, 512  ;;  %p1886_p9 = scmp.lt.s32.totalorder %s2162_s16, %s2162_s16 }
  0x31   : > { %p1879_p2 = scmp.ne.s32.totalorder %s2162_s16, %s1878_s13  ;;  %p1887_p11 = scmp.lt.s32.totalorder %s1878_s13, %s1878_s13 }
  0x33   : > { %p1881_p3 = pnand %p1879_p2, %p2174_p10  ;;  %p1888_p1 = por %p1887_p11, %p1886_p9 }
  0x35   : > { %p1882_p7 = pneg %p1881_p3 }
  0x37   : > { %p1889_p4 = pnand %p1888_p1, %p1882_p7 }
  0x39   : > { %1892 = shalt.err (!%p1889_p4)
}
  0x3a   : > { %1745 = dma.hbm_to_vmem [thread:$0]  (!%p2158_p8), %s2496_s3, 512, %s2162_s16, [#allocation11], %s2056_s12, %s2056_s12, %s2057_s15  }
  0x3b   : > { %s1893_s22 = scalar_lea.hbm %s2495_s2, 512 }
  0x3c   : > { %p1894_p12 = scmp.ne.s32.totalorder %s2495_s2, %s1893_s22  ;;  %p1900_p2 = scmp.lt.u32.totalorder %s1893_s22, %s2495_s2 }
  0x3e   : > { %p1896_p13 = pnand %p1894_p12, %p2174_p10 }
  0x40   : > { %p1897_p0 = pneg %p1896_p13 }
  0x42   : > { %p1902_p3 = pnand %p1900_p2, %p1897_p0 }
  0x44   : > { %1905 = shalt.err (!%p1902_p3)
}
  0x45   : > { %s1906_s13 = scalar_lea.vmem %s249_s18, 512  ;;  %p1914_p1 = scmp.lt.s32.totalorder %s249_s18, %s249_s18 }
  0x46   : > { %p1907_p7 = scmp.ne.s32.totalorder %s249_s18, %s1906_s13  ;;  %p1915_p4 = scmp.lt.s32.totalorder %s1906_s13, %s1906_s13 }
  0x48   : > { %p1909_p9 = pnand %p1907_p7, %p2174_p10  ;;  %p1916_p5 = por %p1915_p4, %p1914_p1 }
  0x4a   : > { %p1910_p11 = pneg %p1909_p9 }
  0x4c   : > { %p1917_p6 = pnand %p1916_p5, %p1910_p11 }
  0x4e   : > { %1920 = shalt.err (!%p1917_p6)
}
  0x4f   : > { %1742 = dma.hbm_to_vmem [thread:$0]  (!%p2158_p8), %s2495_s2, 512, %s249_s18, [#allocation8], %s2056_s12, %s2056_s12, %s2057_s15  }
  0x50   : > { %s2058_s19 = smov [#allocation12]   ;;  %s1921_s23 = scalar_lea.hbm %s2499_s6, 512 }
  0x51   : > { %s280_s20 = sshll.u32 %s2058_s19, 4  ;;  %p1922_p5 = scmp.ne.s32.totalorder %s2499_s6, %s1921_s23  ;;  %s281_s20 = int_to_ptr.vmem [resolvable:$true] %s280_s20 }
  0x52   : > { %p1928_p13 = scmp.lt.u32.totalorder %s1921_s23, %s2499_s6 }
  0x53   : > { %p1924_p6 = pnand %p1922_p5, %p2174_p10 }
  0x55   : > { %p1925_p12 = pneg %p1924_p6 }
  0x57   : > { %p1930_p0 = pnand %p1928_p13, %p1925_p12 }
  0x59   : > { %1933 = shalt.err (!%p1930_p0)
}
  0x5a   : > { %s1934_s18 = scalar_lea.vmem %s281_s20, 512  ;;  %p1942_p9 = scmp.lt.s32.totalorder %s281_s20, %s281_s20 }
  0x5b   : > { %p1935_p2 = scmp.ne.s32.totalorder %s281_s20, %s1934_s18  ;;  %p1943_p11 = scmp.lt.s32.totalorder %s1934_s18, %s1934_s18 }
  0x5d   : > { %p1937_p3 = pnand %p1935_p2, %p2174_p10  ;;  %p1944_p1 = por %p1943_p11, %p1942_p9 }
  0x5f   : > { %p1938_p7 = pneg %p1937_p3 }
  0x61   : > { %p1945_p4 = pnand %p1944_p1, %p1938_p7 }
  0x63   : > { %1948 = shalt.err (!%p1945_p4)
}
  0x64   : > { %1748 = dma.hbm_to_vmem [thread:$0]  (!%p2158_p8), %s2499_s6, 512, %s281_s20, [#allocation11], %s2056_s12, %s2056_s12, %s2057_s15  }
  0x65   : > { %s2268_s24 = sadd.s32 1, %s2051_s30   ;;  %s31_s14 = sadd.s32 1, %s2047_s29 }
  0x66   : > { %s28_s19 = ssub.s32 %s2051_s30, %s2268_s24  ;;  %p38_p10 = scmp.ne.s32.totalorder %s2047_s29, %s2043_s28 }
  0x67   : > { %p29_p5 = scmp.eq.s32.totalorder %s28_s19, 0  ;;  %p39_p6 = scmp.eq.s32.totalorder %s2051_s30, 0 }
  0x68   : > { %p1757_p12 = scmp.lt.s32.totalorder %s2051_s30, 2  ;;  %s297_s21 = sand.u32 1, %s2047_s29  }
  0x69   : > { %s2279_s22 = scalar_select %p29_p5, %s2047_s29, %s31_s14  }
  0x6a   : > { %p40_p13 = por %p39_p6, %p38_p10  ;;  %s1394_s23 = sshll.u32 %s297_s21, 5 }
  0x6b   : > { %s1425_s25 = sshll.u32 %s2051_s30, 9  ;;  %s301_s20 = scalar_lea.vmem [#allocation4], %s1394_s23 }
  0x6c   : > { %s2285_s13 = scalar_lea.hbm %s2493_s0, %s1425_s25  ;;  %s308_s18 = sshll.u32 %s301_s20, 4  ;;  %s2291_s18 = int_to_ptr.vmem [resolvable:$true] %s308_s18 }
  0x6d   : > { %p2287_p8 = pnand %p1757_p12, %p40_p13  ;;  %s2293_s30 = scalar_lea.sflag [#allocation5], %s297_s21 }
  0x6e   : > { %s1949_s17 = scalar_lea.hbm %s2285_s13, 512  ;;  %s1954_s23 = scalar_lea.hbm %s2493_s0, 1024 }
  0x6f   : > { %p1950_p0 = scmp.ne.s32.totalorder %s2285_s13, %s1949_s17  ;;  %p1951_p2 = pneg %p2287_p8 }
  0x70   : > { %p1955_p9 = scmp.lt.u32.totalorder %s2285_s13, %s2493_s0  ;;  %p1956_p11 = scmp.lt.u32.totalorder %s1954_s23, %s1949_s17 }
  0x71   : > { %p1952_p3 = pnand %p1951_p2, %p1950_p0  ;;  %p1958_p4 = scmp.lt.u32.totalorder %s1949_s17, %s2285_s13 }
  0x72   : > { %p1957_p1 = por %p1956_p11, %p1955_p9 }
  0x73   : > { %p1953_p7 = pneg %p1952_p3 }
  0x74   : > { %p1959_p10 = por %p1958_p4, %p1957_p1 }
  0x76   : > { %p1960_p5 = pnand %p1959_p10, %p1953_p7 }
  0x78   : > { %1963 = shalt.err (!%p1960_p5)
}
  0x79   : > { %s1964_s21 = scalar_lea.vmem %s2291_s18, 512  ;;  %s2059_s27 = smov [#allocation4]  }
  0x7a   : > { %p1965_p6 = scmp.ne.s32.totalorder %s2291_s18, %s1964_s21  ;;  %s1969_s20 = sshll.u32 %s2059_s27, 4  ;;  %s1970_s20 = int_to_ptr.vmem [resolvable:$false] %s1969_s20 }
  0x7b   : > { %s1971_s14 = scalar_lea.vmem %s1970_s20, 1024  ;;  %p1972_p0 = scmp.lt.s32.totalorder %s2291_s18, %s1970_s20 }
  0x7c   : > { %p1967_p12 = pnand %p1965_p6, %p1951_p2  ;;  %p1973_p3 = scmp.lt.s32.totalorder %s1971_s14, %s1964_s21 }
  0x7e   : > { %p1968_p13 = pneg %p1967_p12  ;;  %p1974_p9 = por %p1973_p3, %p1972_p0 }
  0x80   : > { %p1975_p11 = pnand %p1974_p9, %p1968_p13 }
  0x82   : > { %1978 = shalt.err (!%p1975_p11)
}
  0x83   : > { %1752 = dma.hbm_to_vmem [thread:$0]  (!%p2287_p8), %s2285_s13, 512, %s2291_s18, %s2293_s30, %s2056_s12, %s2056_s12, %s2057_s15  }
  0x84   : > { %p2510_p2 = scmp.ne.s32.totalorder %s2506_s11, 0 }
  0x85   : > { %s322_s17 = sand.u32 (!%p2510_p2), 1, %s2043_s28   ;;  %p2511_p7 = scmp.ne.s32.totalorder (!%p2510_p2), %s2505_s10, 0 }
  0x86   : > { %320 = sbr.rel (%p2510_p2) target bundleno = 3434 (0xd6a), region = 52  ;;  %s1398_s19 = sshll.u32 (!%p2510_p2), %s322_s17, 5 }
  0x87   : > { %s323_s23 = scalar_lea.sflag (!%p2510_p2), [#allocation5], %s322_s17  ;;  %s2327_s25 = scalar_lea.vmem (!%p2510_p2), [#allocation4], %s1398_s19 }
  0x8d   : > { %2022 = dma.done.wait (%p2511_p7), %s323_s23, 512  }
  0x8e   : > { %2024 = vsyncadd (%p2511_p7), %s323_s23, 4294966784  ;;  %p2512_p1 = scmp.eq.s32.totalorder %s2135_s9, 0 }
  0x90   : > { %2026 = dma.done.wait (%p2512_p1), [#allocation8], 2560   ;;  %p2513_p8 = pmov %p2512_p1 }
  0x91   : > { %p2514_p4 = pmov %p2512_p1 }
  0x92   : > { %2028 = vsyncadd (%p2513_p8), [#allocation8], 4294964736 }
  0x93   : > { %2030 = dma.done.wait (%p2514_p4), [#allocation11], 1024   ;;  %p2515_p10 = pmov %p2512_p1 }
  0x94   : > { %p2516_p5 = scmp.ne.s32.totalorder %s2135_s9, 0 }
  0x95   : > { %2032 = vsyncadd (%p2515_p10), [#allocation11], 4294966272  ;;  %vm375_vm0 = vcmask (!%p2516_p5), 261120   ;;  %v2060_v0 = vmov (!%p2516_p5), 0.0  }
  0x96   : > { %374 = sbr.rel (%p2516_p5) target bundleno = 157 (0x9d), region = 76  ;;  %376 = vst.msk [vmem:[#allocation2] sm:$0xff] (!%p2516_p5), %vm375_vm0, %v2060_v0 }
  0x9d PF: > { %v381_v1 = vld [vmem:[#allocation7] sm:$0xff]  ;;  %v382_v2 = vld [vmem:[#allocation7 + $0x8] sm:$0xff]  ;;  %v383_v3 = vld [vmem:[#allocation7 + $0x10] sm:$0xff]  ;;  %v2061_v6 = vmov 0.0|0.0   ;;  %vm2062_vm1 = vmmov 0   ;;  %v2063_v7 = vmov 0.0  }
  0x9e   : > { %v1628_v4 = vpack.c.bf16 %v382_v2, %v381_v1  ;;  %v384_v5 = vld [vmem:[#allocation7 + $0x18] sm:$0xff]  ;;  %1660 = vmatprep.subr.bf16.mxu1 %v2061_v6  ;;  %1537 = vmatprep.mubr.msk.f32.mxu1 %vm2062_vm1, %v2063_v7  ;;  %v385_v9 = vld [vmem:[#allocation7 + $0x20] sm:$0xff]  ;;  %v386_v10 = vld [vmem:[#allocation7 + $0x28] sm:$0xff]  ;;  %vm510_vm2 = vcmask 261120   ;;  %s2064_s13 = smov 64   ;;  %s2065_s18 = smov 32  }
  0x9f   : > { %v1632_v8 = vpack.c.bf16 %v384_v5, %v383_v3  ;;  %v493_v11 = vld [vmem:[#allocation9] sm:$0xff]  ;;  %v1636_v12 = vpack.c.bf16 %v386_v10, %v385_v9  ;;  %v387_v13 = vld [vmem:[#allocation7 + $0x30] sm:$0xff]  ;;  %v388_v14 = vld [vmem:[#allocation7 + $0x38] sm:$0xff]  ;;  %s2066_s16 = smov 96   ;;  %p1418_p6 = scmp.ne.s32.totalorder %s2135_s9, 1 }
  0xa0   : > { %1629 = vmatprep.subr.bf16.mxu0 %v1628_v4  ;;  %v494_v15 = vld [vmem:[#allocation9 + $0x8] sm:$0xff]  ;;  %v377_v17 = vld [vmem:[%s2327_s25] sm:$0xff]  ;;  %v495_v18 = vld [vmem:[#allocation9 + $0x10] sm:$0xff]  ;;  %v1640_v21 = vpack.c.bf16 %v388_v14, %v387_v13  ;;  %vm2068_vm3 = vmmov (!%p1418_p6), 0  }
  0xa1   : > { %1631 = vmatpush3.bf16.msra.mxu0 %v1628_v4  ;;  %v2346_v16 = vpack.c.bf16 %v494_v15, %v493_v11  ;;  %v496_v19 = vld [vmem:[#allocation9 + $0x18] sm:$0xff]  ;;  %1523 = vmatprep.mubr.f32.mxu0 %v377_v17  ;;  %v497_v22 = vld [vmem:[#allocation10] sm:$0xff]  ;;  %v498_v23 = vld [vmem:[#allocation10 + $0x8] sm:$0xff] }
  0xa2   : > { %1633 = vmatprep.subr.bf16.mxu0 %v1632_v8  ;;  %v2350_v20 = vpack.c.bf16 %v496_v19, %v495_v18  ;;  %v389_v24 = vld [vmem:[#allocation7 + $0x40] sm:$0xff]  ;;  %v390_v25 = vld [vmem:[#allocation7 + $0x48] sm:$0xff]  ;;  %v2354_v26 = vld [vmem:[#allocation2] sm:$0xff]  ;;  %v2356_v27 = vpack.c.bf16 %v498_v23, %v497_v22 }
  0xa3   : > { %1662 = vmatpush3.bf16.msra.mxu1 %v2346_v16  ;;  %v1644_v28 = vpack.c.bf16 %v390_v25, %v389_v24  ;;  %v499_v29 = vld [vmem:[#allocation10 + $0x10] sm:$0xff]  ;;  %v500_v30 = vld [vmem:[#allocation10 + $0x18] sm:$0xff]  ;;  %v393_v35 = vld [vmem:[#allocation7 + $0x60] sm:$0xff] }
  0xa4   : > { %1663 = vmatprep.subr.bf16.mxu1 %v2061_v6  ;;  %v391_v31 = vld [vmem:[#allocation7 + $0x50] sm:$0xff]  ;;  %v392_v32 = vld [vmem:[#allocation7 + $0x58] sm:$0xff]  ;;  %v2362_v33 = vpack.c.bf16 %v500_v30, %v499_v29  ;;  %v394_v36 = vld [vmem:[#allocation7 + $0x68] sm:$0xff] }
  0xa5   : > { %1635 = vmatpush3.bf16.msra.mxu0 %v1632_v8  ;;  %v1648_v34 = vpack.c.bf16 %v392_v32, %v391_v31  ;;  %v1652_v37 = vpack.c.bf16 %v394_v36, %v393_v35  ;;  %v395_v38 = vld [vmem:[#allocation7 + $0x70] sm:$0xff]  ;;  %v396_v39 = vld [vmem:[#allocation7 + $0x78] sm:$0xff]  ;;  %v378_v41 = vld [vmem:[%s2327_s25 + $0x8] sm:$0xff] }
  0xa6   : > { %1637 = vmatprep.subr.bf16.mxu0 %v1636_v12  ;;  %v1656_v40 = vpack.c.bf16 %v396_v39, %v395_v38  ;;  %v2386_v46 = vld [vmem:[%s2497_s4] ss:$0 sm:$0xff]  ;;  %v379_v24 = vld [vmem:[%s2327_s25 + $0x10] sm:$0xff] }
  0xa7   : > { %1665 = vmatpush3.bf16.msra.mxu1 %v2350_v20  ;;  %v2392_v54 = vld [vmem:[%s2498_s5] ss:$0 sm:$0xff] }
  0xa8   : > { %1666 = vmatprep.subr.bf16.mxu1 %v2061_v6  ;;  %v380_v25 = vld [vmem:[%s2327_s25 + $0x18] sm:$0xff] }
  0xa9   : > { %1639 = vmatpush3.bf16.msra.mxu0 %v1636_v12 }
  0xaa   : > { %1641 = vmatprep.subr.bf16.mxu0 %v1640_v21  ;;  %1538 = vmatmul.mubr.msk.f32.vlgmr.msra.gmra.mrb[0].mxu1 %vm510_vm2, %v2354_v26 }
  0xab   : > { %1668 = vmatpush3.bf16.msra.mxu1 %v2356_v27  ;;  %1548 = vmatprep.mubr.msk.f32.mxu1 %vm2062_vm1, %v2063_v7 }
  0xac   : > { %1669 = vmatprep.subr.bf16.mxu1 %v2061_v6 }
  0xad   : > { %1643 = vmatpush3.bf16.msra.mxu0 %v1640_v21 }
  0xae   : > { %1645 = vmatprep.subr.bf16.mxu0 %v1644_v28 }
  0xaf   : > { %1671 = vmatpush3.bf16.msra.mxu1 %v2362_v33 }
  0xb0   : > { %1672 = vmatprep.subr.bf16.mxu1 %v2061_v6 }
  0xb1   : > { %1647 = vmatpush3.bf16.msra.mxu0 %v1644_v28 }
  0xb2   : > { %1649 = vmatprep.subr.bf16.mxu0 %v1648_v34  ;;  %1549 = vmatmul.mubr.msk.f32.vlgmr.msra.gmra.mrb[2].mxu1 %vm510_vm2, %v2354_v26 }
  0xb3   : > { %1674 = vmatpush3.bf16.msra.mxu1 %v2346_v16  ;;  %1559 = vmatprep.mubr.msk.f32.mxu1 %vm2062_vm1, %v2063_v7 }
  0xb4   : > { %1675 = vmatprep.subr.bf16.mxu1 %v2061_v6 }
  0xb5   : > { %1651 = vmatpush3.bf16.msra.mxu0 %v1648_v34 }
  0xb6   : > { %1653 = vmatprep.subr.bf16.mxu0 %v1652_v37 }
  0xb7   : > { %1677 = vmatpush3.bf16.msra.mxu1 %v2350_v20 }
  0xb8   : > { %1678 = vmatprep.subr.bf16.mxu1 %v2061_v6 }
  0xb9   : > { %1655 = vmatpush3.bf16.msra.mxu0 %v1652_v37 }
  0xba   : > { %1657 = vmatprep.subr.bf16.mxu0 %v1656_v40 }
  0xbd   : > { %1659 = vmatpush3.bf16.msra.mxu0 %v1656_v40 }
  0xbe   : > { %1684 = vmatprep.subr.bf16.mxu0 %v2061_v6 }
  0xc0   : > { %1524 = vmatmul.mubr.f32.vlgmr.msra.gmra.mrb[0].mxu0 %v378_v41 }
  0xc1   : > { %1686 = vmatpush3.bf16.msra.mxu0 %v2346_v16  ;;  %1526 = vmatprep.mubr.f32.mxu0 %v379_v24 }
  0xc2   : > { %1687 = vmatprep.subr.bf16.mxu0 %v2061_v6 }
  0xc4   : > { %1527 = vmatmul.mubr.f32.gmra.mrb[2].mxu0 %v380_v25 }
  0xc5   : > { %1689 = vmatpush3.bf16.msra.mxu0 %v2350_v20  ;;  %1581 = vmatprep.mubr.msk.f32.mxu0 %vm2062_vm1, %v2063_v7 }
  0xc6   : > { %1696 = vmatprep.subr.bf16.mxu0 %v2061_v6 }
 0x17d   : > { %v580_v42 = vpop.f32.mrb[0].mxu1 }
 0x17e   : > { %v1539_v43 = vpop.f32.mrb[1].mxu1 }
 0x185   : > { %v657_v44 = vpop.f32.mrb[2].mxu1 }
 0x186   : > { %v1550_v45 = vpop.f32.mrb[3].mxu1  ;;  %v658_v55 = vadd.f32 %v2392_v54, %v657_v44 }
 0x193   : > { %v1525_v47 = vpop.f32.mrb[0].mxu0 }
 0x194   : > { %v470_v48 = vpop.f32.mrb[1].mxu0  ;;  %v476_v4 = vadd.f32 %v1525_v47, %v2386_v46 }
 0x195   : > { %v471_v49 = vadd.f32 %v2386_v46, %v470_v48 }
 0x197   : > { %v584_v50 = vadd.f32 %v580_v42, %v471_v49  ;;  %v1528_v31 = vpop.f32.mrb[2].mxu0 }
 0x198   : > { %v480_v32 = vpop.f32.mrb[3].mxu0 }
 0x199   : > { %v1407_v51 = vmul.f32 -1.442695, %v584_v50  ;;  %v481_v35 = vadd.f32 %v2386_v46, %v480_v32 }
 0x19b   : > { %1813 = vpow2.f32 %v1407_v51  ;;  %v486_v51 = vadd.f32 %v1528_v31, %v2386_v46 }
 0x1a5   : > { %v1814_v52 = vpop.eup %1813 }
 0x1a6   : > { %v588_v53 = vadd.f32 1.0, %v1814_v52 }
 0x1a8   : > { %1815 = vrcp.f32 %v588_v53 }
 0x1b2   : > { %v1816_v56 = vpop.eup %1815 }
 0x1b3   : > { %v661_v57 = vmul.f32 %v1816_v56, %v658_v55 }
 0x1b5   : > { %663 = vrot.lane.b32.xlu0 %v661_v57, %s2064_s13 }
 0x227   : > { %v664_v58 = vpop.permute.xlu0 %663 }
 0x228   : > { %v666_v59 = vadd.f32 %v664_v58, %v471_v49 }
 0x22a   : > { %1817 = vtanh.f32 %v666_v59 }
 0x234   : > { %v1818_v60 = vpop.eup %1817 }
 0x235   : > { %669 = vrot.lane.b32.xlu0 %v1818_v60, %s2064_s13 }
 0x2a7   : > { %v670_v61 = vpop.permute.xlu0 %669 }
 0x2a8   : > { %v672_v62 = vsub.f32 %v2354_v26, %v670_v61 }
 0x2aa   : > { %674 = vrot.lane.b32.xlu1 %v672_v62, %s2065_s18 }
 0x31c   : > { %v675_v63 = vpop.permute.xlu1 %674 }
 0x31d   : > { %v677_v0 = vmul.f32 %v1816_v56, %v675_v63 }
 0x31f   : > { %679 = vrot.lane.b32.xlu1 %v677_v0, %s2065_s18 }
 0x391   : > { %v680_v1 = vpop.permute.xlu1 %679 }
 0x392   : > { %v682_v2 = vadd.f32 %v1818_v60, %v680_v1 }
 0x394   : > { %686 = vrot.lane.b32.xlu0 %v682_v2, %s2064_s13 }
 0x406   : > { %v687_v3 = vpop.permute.xlu0 %686 }
 0x407   : > { %1560 = vmatmul.mubr.msk.f32.vlgmr.msra.gmra.mrb[4].mxu1 %vm510_vm2, %v687_v3 }
 0x408   : > { %1680 = vmatpush3.bf16.msra.mxu1 %v2356_v27  ;;  %1570 = vmatprep.mubr.msk.f32.mxu1 %vm2062_vm1, %v2063_v7 }
 0x409   : > { %1681 = vmatprep.subr.bf16.mxu1 %v2061_v6 }
 0x40c   : > { %1683 = vmatpush3.bf16.msra.mxu1 %v2362_v33 }
 0x40d   : > { %1690 = vmatprep.subr.bf16.mxu1 %v2061_v6 }
 0x40f   : > { %1571 = vmatmul.mubr.msk.f32.vlgmr.msra.gmra.mrb[6].mxu1 %vm510_vm2, %v687_v3 }
 0x410   : > { %1692 = vmatpush3.bf16.msra.mxu1 %v2356_v27  ;;  %1592 = vmatprep.mubr.msk.f32.mxu1 %vm2062_vm1, %v2063_v7 }
 0x411   : > { %1693 = vmatprep.subr.bf16.mxu1 %v2061_v6 }
 0x414   : > { %1695 = vmatpush3.bf16.msra.mxu1 %v2362_v33 }
 0x415   : > { %1702 = vmatprep.subr.bf16.mxu1 %v2061_v6 }
 0x4da   : > { %v756_v5 = vpop.f32.mrb[4].mxu1 }
 0x4db   : > { %v760_v8 = vadd.f32 %v756_v5, %v476_v4  ;;  %v1561_v9 = vpop.f32.mrb[5].mxu1 }
 0x4dc   : > { %v1208_v9 = vld [vmem:[#allocation12] sm:$0xff] (!%p1418_p6) }
 0x4dd   : > { %v1410_v10 = vmul.f32 -1.442695, %v760_v8 }
 0x4df   : > { %1819 = vpow2.f32 %v1410_v10  ;;  %v1209_v10 = vld [vmem:[#allocation12 + $0x8] sm:$0xff] (!%p1418_p6) }
 0x4e2   : > { %v833_v11 = vpop.f32.mrb[6].mxu1 }
 0x4e3   : > { %v1572_v12 = vpop.f32.mrb[7].mxu1  ;;  %v834_v15 = vadd.f32 %v2392_v54, %v833_v11  ;;  %v1210_v11 = vld [vmem:[#allocation12 + $0x10] sm:$0xff] (!%p1418_p6) }
 0x4e4   : > { %v2067_v12 = vmov (!%p1418_p6), 0.0|0.0  }
 0x4e9   : > { %v1820_v13 = vpop.eup %1819 }
 0x4ea   : > { %v764_v14 = vadd.f32 1.0, %v1820_v13  ;;  %v1709_v13 = vpack.c.bf16 (!%p1418_p6), %v1209_v10, %v1208_v9 }
 0x4ec   : > { %1821 = vrcp.f32 %v764_v14  ;;  %v1211_v14 = vld [vmem:[#allocation12 + $0x18] sm:$0xff] (!%p1418_p6) }
 0x4f6   : > { %v1822_v17 = vpop.eup %1821 }
 0x4f7   : > { %v837_v18 = vmul.f32 %v1822_v17, %v834_v15  ;;  %v2069_v15 = vmov (!%p1418_p6), 0.0  }
 0x4f9   : > { %839 = vrot.lane.b32.xlu1 %v837_v18, %s2064_s13  ;;  %v1419_v18 = vld [vmem:[%s2500_s7] ss:$0 sm:$0xff] (!%p1418_p6) }
 0x56b   : > { %v840_v19 = vpop.permute.xlu1 %839 }
 0x56c   : > { %v842_v21 = vadd.f32 %v840_v19, %v476_v4 }
 0x56e   : > { %1823 = vtanh.f32 %v842_v21 }
 0x578   : > { %v1824_v22 = vpop.eup %1823 }
 0x579   : > { %v844_v23 = vsub.f32 %v682_v2, %v1824_v22 }
 0x57b   : > { %846 = vrot.lane.b32.xlu0 %v844_v23, %s2066_s16 }
 0x5ed   : > { %v847_v26 = vpop.permute.xlu0 %846 }
 0x5ee   : > { %v849_v28 = vmul.f32 %v1822_v17, %v847_v26  ;;  %v1712_v17 = vpack.c.bf16 (!%p1418_p6), %v1211_v14, %v1210_v11 }
 0x5f0   : > { %851 = vrot.lane.b32.xlu1 %v849_v28, %s2065_s18 }
 0x662   : > { %v852_v29 = vpop.permute.xlu1 %851 }
 0x663   : > { %v854_v30 = vadd.f32 %v1824_v22, %v852_v29 }
 0x665   : > { %858 = vrot.lane.b32.xlu0 %v854_v30, %s2064_s13 }
 0x6d7   : > { %v859_v34 = vpop.permute.xlu0 %858 }
 0x6d8   : > { %1582 = vmatmul.mubr.msk.f32.vlgmr.msra.gmra.mrb[4].mxu0 %vm510_vm2, %v859_v34  ;;  %1593 = vmatmul.mubr.msk.f32.vlgmr.msra.gmra.mrb[8].mxu1 %vm510_vm2, %v859_v34 }
 0x6d9   : > { %1698 = vmatpush3.bf16.msra.mxu0 %v2346_v16  ;;  %1704 = vmatpush3.bf16.msra.mxu1 %v2356_v27 }
 0x6da   : > { %1699 = vmatprep.subr.bf16.mxu0 %v2061_v6  ;;  %1705 = vmatprep.subr.bf16.mxu1 %v2061_v6 }
 0x6db   : > { %1603 = vmatprep.mubr.msk.f32.mxu0 %vm2062_vm1, %v2063_v7  ;;  %1614 = vmatprep.mubr.msk.f32.mxu1 %vm2062_vm1, %v2063_v7 }
 0x6dd   : > { %1701 = vmatpush3.bf16.msra.mxu0 %v2350_v20  ;;  %1707 = vmatpush3.bf16.msra.mxu1 %v2362_v33 }
 0x6de   : > { %1708 = vmatprep.subr.bf16.mxu0 (!%p1418_p6), %v2067_v12 }
 0x7ab   : > { %v928_v36 = vpop.f32.mrb[4].mxu0  ;;  %v1005_v16 = vpop.f32.mrb[8].mxu1 }
 0x7ac   : > { %v932_v37 = vadd.f32 %v928_v36, %v481_v35  ;;  %v1583_v27 = vpop.f32.mrb[5].mxu0  ;;  %v1594_v38 = vpop.f32.mrb[9].mxu1  ;;  %v1006_v41 = vadd.f32 %v2392_v54, %v1005_v16 }
 0x7ae   : > { %v1413_v39 = vmul.f32 -1.442695, %v932_v37 }
 0x7b0   : > { %1825 = vpow2.f32 %v1413_v39 }
 0x7ba   : > { %v1826_v6 = vpop.eup %1825 }
 0x7bb   : > { %v936_v40 = vadd.f32 1.0, %v1826_v6 }
 0x7bd   : > { %1827 = vrcp.f32 %v936_v40 }
 0x7c7   : > { %v1828_v42 = vpop.eup %1827 }
 0x7c8   : > { %v1009_v7 = vmul.f32 %v1828_v42, %v1006_v41 }
 0x7ca   : > { %1011 = vrot.lane.b32.xlu1 %v1009_v7, %s2064_s13 }
 0x83c   : > { %v1012_v20 = vpop.permute.xlu1 %1011 }
 0x83d   : > { %v1014_v33 = vadd.f32 %v1012_v20, %v481_v35 }
 0x83f   : > { %1829 = vtanh.f32 %v1014_v33 }
 0x849   : > { %v1830_v43 = vpop.eup %1829 }
 0x84a   : > { %v1016_v44 = vsub.f32 %v854_v30, %v1830_v43 }
 0x84c   : > { %1018 = vrot.lane.b32.xlu0 %v1016_v44, %s2066_s16 }
 0x8be   : > { %v1019_v45 = vpop.permute.xlu0 %1018 }
 0x8bf   : > { %v1021_v47 = vmul.f32 %v1828_v42, %v1019_v45 }
 0x8c1   : > { %1023 = vrot.lane.b32.xlu1 %v1021_v47, %s2065_s18 }
 0x933   : > { %v1024_v48 = vpop.permute.xlu1 %1023 }
 0x934   : > { %v1026_v49 = vadd.f32 %v1830_v43, %v1024_v48 }
 0x936   : > { %1030 = vrot.lane.b32.xlu0 %v1026_v49, %s2064_s13 }
 0x9a8   : > { %v1031_v50 = vpop.permute.xlu0 %1030 }
 0x9a9   : > { %1604 = vmatmul.mubr.msk.f32.vlgmr.msra.gmra.mrb[6].mxu0 %vm510_vm2, %v1031_v50  ;;  %1615 = vmatmul.mubr.msk.f32.vlgmr.msra.gmra.mrb[10].mxu1 %vm510_vm2, %v1031_v50 }
 0x9aa   : > { %1625 = vmatprep.mubr.msk.f32.mxu0 (!%p1418_p6), %vm2068_vm3, %v2069_v15  ;;  %1710 = vmatpush3.bf16.msra.mxu0 (!%p1418_p6), %v1709_v13 }
 0x9ab   : > { %1711 = vmatprep.subr.bf16.mxu0 (!%p1418_p6), %v2067_v12 }
 0x9ae   : > { %1713 = vmatpush3.bf16.msra.mxu0 (!%p1418_p6), %v1712_v17 }
 0xa7c   : > { %v1100_v52 = vpop.f32.mrb[6].mxu0  ;;  %v1177_v53 = vpop.f32.mrb[10].mxu1 }
 0xa7d   : > { %v1104_v55 = vadd.f32 %v1100_v52, %v486_v51  ;;  %v1605_v56 = vpop.f32.mrb[7].mxu0  ;;  %v1616_v57 = vpop.f32.mrb[11].mxu1  ;;  %v1178_v61 = vadd.f32 %v2392_v54, %v1177_v53 }
 0xa7f   : > { %v1416_v58 = vmul.f32 -1.442695, %v1104_v55 }
 0xa81   : > { %1831 = vpow2.f32 %v1416_v58 }
 0xa8b   : > { %v1832_v59 = vpop.eup %1831 }
 0xa8c   : > { %v1108_v60 = vadd.f32 1.0, %v1832_v59 }
 0xa8e   : > { %1833 = vrcp.f32 %v1108_v60 }
 0xa98   : > { %v1834_v62 = vpop.eup %1833 }
 0xa99   : > { %v1181_v63 = vmul.f32 %v1834_v62, %v1178_v61 }
 0xa9b   : > { %1183 = vrot.lane.b32.xlu1 %v1181_v63, %s2064_s13 }
 0xb0d   : > { %v1184_v0 = vpop.permute.xlu1 %1183 }
 0xb0e   : > { %v1186_v1 = vadd.f32 %v1184_v0, %v486_v51 }
 0xb10   : > { %1835 = vtanh.f32 %v1186_v1 }
 0xb1a   : > { %v1836_v46 = vpop.eup %1835 }
 0xb1b   : > { %v1188_v2 = vsub.f32 %v1026_v49, %v1836_v46 }
 0xb1d   : > { %1190 = vrot.lane.b32.xlu0 %v1188_v2, %s2066_s16 }
 0xb8f   : > { %v1191_v3 = vpop.permute.xlu0 %1190 }
 0xb90   : > { %v1193_v4 = vmul.f32 %v1834_v62, %v1191_v3 }
 0xb92   : > { %1195 = vrot.lane.b32.xlu1 %v1193_v4, %s2065_s18 }
 0xc04   : > { %v1196_v5 = vpop.permute.xlu1 %1195 }
 0xc05   : > { %v1198_v8 = vadd.f32 %v1836_v46, %v1196_v5 }
 0xc07   : > { %1200 = vrot.lane.b32.xlu0 %v1198_v8, %s2064_s13 }
 0xc74   : > { %1207 = sbr.rel (%p1418_p6) target bundleno = 3409 (0xd51), region = 80 }
 0xc79   : > { %v1201_v54 = vpop.permute.xlu0 %1200 }
 0xc7a   : > { %1203 = vst.msk [vmem:[#allocation2] sm:$0xff] %vm510_vm2, %v1201_v54  ;;  %1626 = vmatmul.mubr.msk.f32.vlgmr.msra.gmra.mrb[0].mxu0 (!%p1418_p6), %vm510_vm2, %v1201_v54 }
 0xd4d   : > { %v1287_v19 = vpop.f32.mrb[0].mxu0 }
 0xd4e   : > { %v1288_v21 = vadd.f32 %v1419_v18, %v1287_v19  ;;  %v1627_v22 = vpop.f32.mrb[1].mxu0 }
 0xd50   : > { %1291 = vst [vmem:[#allocation13] sm:$0xff] %v1288_v21 }
 0xd51 PF: > { %p1762_p12 = scmp.eq.s32.totalorder %s2135_s9, 1  ;;  %s2070_s21 = smov [#allocation13]  }
 0xd52   : > { %s1299_s27 = sshll.u32 %s2070_s21, 4  ;;  %s1300_s27 = int_to_ptr.vmem [resolvable:$true] %s1299_s27 }
 0xd53   : > { %s1979_s20 = scalar_lea.vmem %s1300_s27, 128  ;;  %p1986_p9 = scmp.lt.s32.totalorder %s1300_s27, %s1300_s27 }
 0xd54   : > { %p1980_p13 = scmp.ne.s32.totalorder %s1300_s27, %s1979_s20  ;;  %p1987_p11 = scmp.lt.s32.totalorder %s1979_s20, %s1979_s20 }
 0xd56   : > { %p1981_p0 = pnand %p1980_p13, %p1762_p12  ;;  %p1988_p2 = por %p1987_p11, %p1986_p9 }
 0xd58   : > { %p1982_p3 = pneg %p1981_p0 }
 0xd5a   : > { %p1989_p7 = pnand %p1988_p2, %p1982_p3 }
 0xd5c   : > { %1992 = shalt.err (!%p1989_p7)
}
 0xd5d   : > { %s1993_s19 = scalar_lea.hbm %s2501_s8, 128 }
 0xd5e   : > { %p1994_p1 = scmp.ne.s32.totalorder %s2501_s8, %s1993_s19  ;;  %p1999_p10 = scmp.lt.u32.totalorder %s1993_s19, %s2501_s8 }
 0xd60   : > { %p1995_p8 = pnand %p1994_p1, %p1762_p12 }
 0xd62   : > { %p1996_p4 = pneg %p1995_p8 }
 0xd64   : > { %p2001_p5 = pnand %p1999_p10, %p1996_p4 }
 0xd66   : > { %2004 = shalt.err (!%p2001_p5)
}
 0xd67   : > { %1733 = dma.vmem_to_hbm [thread:$0]  (%p1762_p12), %s1300_s27, 128, %s2501_s8, [#allocation6]  }
 0xd68   : > { %2034 = dma.done.wait (%p1762_p12), [#allocation6], 128  }
 0xd69   : > { %2036 = vsyncadd (%p1762_p12), [#allocation6], 4294967168 }
 0xd6a PF: > { %p21_p6 = scmp.ge.s32.totalorder %s2268_s24, 4   ;;  %s2517_s27 = smov %s2043_s28 }
 0xd6b   : > { %s2518_s28 = smov %s2047_s29  ;;  %s2519_s29 = smov %s2279_s22 }
 0xd6c   : > { %s2520_s30 = smov %s2268_s24  ;;  %23 = sbr.rel (!%p21_p6) target bundleno = 6 (0x6), region = 116 }
 0xd73   :  { %1312 = vsyncpa [#allocation5], 1 }
 0xd74   :  { %1314 = vsyncpa [#allocation5 + $0x1], 1 }
 0xd75   :  { %1315 = vsyncpa [#allocation8], 1 }
 0xd76   :  { %1316 = vsyncpa [#allocation11], 1 }
 0xd77   :  { %1317 = vsyncpa [#allocation6], 1 }
 0xd78   :  { %1319 = vsyncpa [#allocation6 + $0x1], 1 }

</bundles_post_ra>
